<compile_context>
chip_gen: v5e
topology: v5e:2x2
jax: 0.10.0
libtpu: 0.0.40
codegen_flags: <defaults>
</compile_context>

<pallas_src>
import jax
import jax.numpy as jnp
from jax.experimental import pallas as pl
from jax.experimental.pallas import tpu as pltpu


def _round_up(x, m):
    return ((x + m - 1) // m) * m


def _cdiv(a, b):
    return (a + b - 1) // b


def qnet_kernel(x_ref, w1_ref, b1_ref, w2_ref, b2_ref, w3_ref, b3_ref, o_ref):
    # fc1 + ReLU: cast the raw f32 input to bf16 in-kernel (rides under MXU
    # slack), accumulate in f32 on the MXU, bias add + ReLU in f32.
    x = x_ref[...].astype(w1_ref.dtype)
    h1 = jnp.dot(x, w1_ref[...], preferred_element_type=jnp.float32) + b1_ref[...]
    h1 = jnp.maximum(h1, 0.0)
    # fc2 + ReLU
    h2 = jnp.dot(h1.astype(w2_ref.dtype), w2_ref[...],
                 preferred_element_type=jnp.float32) + b2_ref[...]
    h2 = jnp.maximum(h2, 0.0)
    # fc3 (no activation) -> unpadded output columns (full last dim of the array)
    o_ref[...] = (jnp.dot(h2.astype(w3_ref.dtype), w3_ref[...],
                          preferred_element_type=jnp.float32)
                  + b3_ref[...]).astype(o_ref.dtype)


def _choose_batch_tiling(B, tb_max=2048, min_tiles=2):
    """Pick (TB, B_pad, grid_len): waste-bounded padding + >=2 tiles for v7x."""
    num_tiles = max(1, _cdiv(B, tb_max))
    # Only force multiple tiles when the batch is big enough that splitting
    # doesn't create degenerate tiles (helps v7x megacore; harmless elsewhere).
    if B >= 32 * min_tiles:
        num_tiles = max(num_tiles, min_tiles)
    TB = _round_up(_cdiv(B, num_tiles), 16)     # 16-sublane aligned for all dtypes
    B_pad = _round_up(B, TB)                    # waste < TB (bounded by ~B/num_tiles)
    return TB, B_pad, B_pad // TB


def qnetwork_forward(state, params, *, tb_max=2048):
    """state: (B, state_size) f32. Returns (B, output_size) f32."""
    w1, b1 = params["w1"], params["b1"]
    w2, b2 = params["w2"], params["b2"]
    w3, b3 = params["w3"], params["b3"]

    B, S = state.shape
    assert w1.shape[0] == S, "w1 must be stored as (state_size, hidden)"
    H = w1.shape[1]          # hidden (padded to a multiple of 128 lanes)
    OUT = w3.shape[1]        # true output size (no lane padding)

    TB, B_pad, grid_len = _choose_batch_tiling(B, tb_max=tb_max)
    x = state
    if B_pad > B:
        x = jnp.pad(x, ((0, B_pad - B), (0, 0)))   # small f32 pad, rows only

    resident = lambda shape: pl.BlockSpec(shape, lambda i: (0, 0))

    itemsize = lambda a: a.dtype.itemsize
    cost = pl.CostEstimate(
        flops=2 * B_pad * (S * H + H * H + H * OUT),
        transcendentals=0,
        bytes_accessed=(B_pad * S * 4
                        + w1.size * itemsize(w1) + w2.size * itemsize(w2)
                        + w3.size * itemsize(w3)
                        + b1.size * itemsize(b1) + b2.size * itemsize(b2)
                        + b3.size * itemsize(b3)
                        + B_pad * OUT * 4),
    )

    out = pl.pallas_call(
        qnet_kernel,
        out_shape=jax.ShapeDtypeStruct((B_pad, OUT), jnp.float32),
        grid=(grid_len,),
        in_specs=[
            pl.BlockSpec((TB, S), lambda i: (i, 0)),   # x: tiled over batch, raw f32
            resident(w1.shape), resident(b1.shape),    # weights/biases VMEM-resident
            resident(w2.shape), resident(b2.shape),
            resident(w3.shape), resident(b3.shape),
        ],
        out_specs=pl.BlockSpec((TB, OUT), lambda i: (i, 0)),
        compiler_params=pltpu.CompilerParams(
            dimension_semantics=("parallel",),   # shard batch tiles across TCs (v7x)
            vmem_limit_bytes=32 << 20,           # tiny footprint; safe on 64 MiB v7x
        ),
        cost_estimate=cost,
    )(x, w1, b1, w2, b2, w3, b3)

    return out[:B] if B_pad > B else out


def init_params(key, state_size, output_size, hidden_size=128,
                weight_dtype=jnp.bfloat16):
    """PyTorch nn.Linear-style init: U(-1/sqrt(fan_in), 1/sqrt(fan_in)).

    Weights are stored pre-transposed (in, out) and cast to bf16; biases stay
    f32.  Only the hidden dimension is zero-padded (to a 128-lane multiple);
    the state and output dimensions are kept at their true sizes.
    """
    H = _round_up(hidden_size, 128)

    def linear(k, fan_in, fan_out, pad_in, pad_out):
        kw, kb = jax.random.split(k)
        bound = 1.0 / jnp.sqrt(jnp.float32(fan_in))
        w = jax.random.uniform(kw, (fan_in, fan_out), jnp.float32, -bound, bound)
        b = jax.random.uniform(kb, (1, fan_out), jnp.float32, -bound, bound)
        w = jnp.pad(w, ((0, pad_in - fan_in), (0, pad_out - fan_out))).astype(weight_dtype)
        b = jnp.pad(b, ((0, 0), (0, pad_out - fan_out)))  # f32
        return w, b

    k1, k2, k3 = jax.random.split(key, 3)
    w1, b1 = linear(k1, state_size, hidden_size, state_size, H)   # (S, H)
    w2, b2 = linear(k2, hidden_size, hidden_size, H, H)           # (H, H)
    w3, b3 = linear(k3, hidden_size, output_size, H, output_size)  # (H, OUT)
    return {"w1": w1, "b1": b1, "w2": w2, "b2": b2, "w3": w3, "b3": b3}


def reference_forward(state, params):
    """Plain-JAX reference using the exact same (bf16) parameters."""
    w1, b1 = params["w1"], params["b1"]
    w2, b2 = params["w2"], params["b2"]
    w3, b3 = params["w3"], params["b3"]
    x = state.astype(w1.dtype)
    h1 = jnp.maximum(jnp.dot(x, w1, preferred_element_type=jnp.float32) + b1, 0.0)
    h2 = jnp.maximum(jnp.dot(h1.astype(w2.dtype), w2,
                             preferred_element_type=jnp.float32) + b2, 0.0)
    return jnp.dot(h2.astype(w3.dtype), w3, preferred_element_type=jnp.float32) + b3


if __name__ == "__main__":
    key = jax.random.PRNGKey(0)
    k_param, k_state = jax.random.split(key)

    batch = 8
    state_size = 32
    hidden_size = 128
    output_size = 8

    params = init_params(k_param, state_size, output_size, hidden_size)
    state = jax.random.normal(k_state, (batch, state_size), jnp.float32)

    out = qnetwork_forward(state, params)
    out = jax.block_until_ready(out)

    ref = reference_forward(state, params)
    assert out.shape == (batch, output_size), out.shape
    assert jnp.allclose(out, ref, atol=2e-3, rtol=2e-3), \
        float(jnp.max(jnp.abs(out - ref)))

    print("KERNEL_OK")
</pallas_src>

<mosaic_0001>
module attributes {stable_mosaic.version = 11 : i64} {
  func.func @qnet_kernel(%arg0: i32, %arg1: memref<16x32xf32, #tpu.memory_space<vmem>>, %arg2: memref<32x128xbf16, #tpu.memory_space<vmem>>, %arg3: memref<1x128xf32, #tpu.memory_space<vmem>>, %arg4: memref<128x128xbf16, #tpu.memory_space<vmem>>, %arg5: memref<1x128xf32, #tpu.memory_space<vmem>>, %arg6: memref<128x8xbf16, #tpu.memory_space<vmem>>, %arg7: memref<1x8xf32, #tpu.memory_space<vmem>>, %arg8: memref<16x8xf32, #tpu.memory_space<vmem>>) attributes {dimension_semantics = [#tpu.dimension_semantics<parallel>], iteration_bounds = array<i64: 1>, scalar_prefetch = 0 : i64, scratch_operands = 0 : i64, tpu.core_type = #tpu.core_type<tc>, window_params = [{transform_indices = @transform_0, window_bounds = array<i64: 16, 32>}, {pipeline_mode = #tpu.pipeline_mode<synchronous>, transform_indices = @transform_1, window_bounds = array<i64: 32, 128>}, {pipeline_mode = #tpu.pipeline_mode<synchronous>, transform_indices = @transform_2, window_bounds = array<i64: 1, 128>}, {pipeline_mode = #tpu.pipeline_mode<synchronous>, transform_indices = @transform_3, window_bounds = array<i64: 128, 128>}, {pipeline_mode = #tpu.pipeline_mode<synchronous>, transform_indices = @transform_4, window_bounds = array<i64: 1, 128>}, {pipeline_mode = #tpu.pipeline_mode<synchronous>, transform_indices = @transform_5, window_bounds = array<i64: 128, 8>}, {pipeline_mode = #tpu.pipeline_mode<synchronous>, transform_indices = @transform_6, window_bounds = array<i64: 1, 8>}, {transform_indices = @transform_7, window_bounds = array<i64: 16, 8>}]} {
    %c0 = arith.constant 0 : index
    %c0_0 = arith.constant 0 : index
    %0 = vector.load %arg1[%c0, %c0_0] : memref<16x32xf32, #tpu.memory_space<vmem>>, vector<16x32xf32>
    %1 = arith.truncf %0 : vector<16x32xf32> to vector<16x32xbf16>
    %c0_1 = arith.constant 0 : index
    %c0_2 = arith.constant 0 : index
    %2 = vector.load %arg2[%c0_1, %c0_2] : memref<32x128xbf16, #tpu.memory_space<vmem>>, vector<32x128xbf16>
    %cst = arith.constant dense<0.000000e+00> : vector<16x128xf32>
    %3 = tpu.matmul %1, %2, %cst {dimension_numbers = #tpu.dot_dimension_numbers<[1], [0], [0], [1], [0, 0, 1, 1], [], []>} : vector<16x32xbf16>, vector<32x128xbf16>, vector<16x128xf32> -> vector<16x128xf32>
    %c0_3 = arith.constant 0 : index
    %c0_4 = arith.constant 0 : index
    %4 = vector.load %arg3[%c0_3, %c0_4] : memref<1x128xf32, #tpu.memory_space<vmem>>, vector<1x128xf32>
    %5 = vector.broadcast %4 : vector<1x128xf32> to vector<16x128xf32>
    %6 = arith.addf %3, %5 : vector<16x128xf32>
    %cst_5 = arith.constant 0.000000e+00 : f32
    %7 = vector.broadcast %cst_5 : f32 to vector<16x128xf32>
    %8 = arith.maximumf %6, %7 : vector<16x128xf32>
    %9 = arith.truncf %8 : vector<16x128xf32> to vector<16x128xbf16>
    %c0_6 = arith.constant 0 : index
    %c0_7 = arith.constant 0 : index
    %10 = vector.load %arg4[%c0_6, %c0_7] : memref<128x128xbf16, #tpu.memory_space<vmem>>, vector<128x128xbf16>
    %cst_8 = arith.constant dense<0.000000e+00> : vector<16x128xf32>
    %11 = tpu.matmul %9, %10, %cst_8 {dimension_numbers = #tpu.dot_dimension_numbers<[1], [0], [0], [1], [0, 0, 1, 1], [], []>} : vector<16x128xbf16>, vector<128x128xbf16>, vector<16x128xf32> -> vector<16x128xf32>
    %c0_9 = arith.constant 0 : index
    %c0_10 = arith.constant 0 : index
    %12 = vector.load %arg5[%c0_9, %c0_10] : memref<1x128xf32, #tpu.memory_space<vmem>>, vector<1x128xf32>
    %13 = vector.broadcast %12 : vector<1x128xf32> to vector<16x128xf32>
    %14 = arith.addf %11, %13 : vector<16x128xf32>
    %cst_11 = arith.constant 0.000000e+00 : f32
    %15 = vector.broadcast %cst_11 : f32 to vector<16x128xf32>
    %16 = arith.maximumf %14, %15 : vector<16x128xf32>
    %17 = arith.truncf %16 : vector<16x128xf32> to vector<16x128xbf16>
    %c0_12 = arith.constant 0 : index
    %c0_13 = arith.constant 0 : index
    %18 = vector.load %arg6[%c0_12, %c0_13] : memref<128x8xbf16, #tpu.memory_space<vmem>>, vector<128x8xbf16>
    %cst_14 = arith.constant dense<0.000000e+00> : vector<16x8xf32>
    %19 = tpu.matmul %17, %18, %cst_14 {dimension_numbers = #tpu.dot_dimension_numbers<[1], [0], [0], [1], [0, 0, 1, 1], [], []>} : vector<16x128xbf16>, vector<128x8xbf16>, vector<16x8xf32> -> vector<16x8xf32>
    %c0_15 = arith.constant 0 : index
    %c0_16 = arith.constant 0 : index
    %20 = vector.load %arg7[%c0_15, %c0_16] : memref<1x8xf32, #tpu.memory_space<vmem>>, vector<1x8xf32>
    %21 = vector.broadcast %20 : vector<1x8xf32> to vector<16x8xf32>
    %22 = arith.addf %19, %21 : vector<16x8xf32>
    %c0_17 = arith.constant 0 : index
    %c0_18 = arith.constant 0 : index
    %23 = vector.load %arg8[%c0_17, %c0_18] : memref<16x8xf32, #tpu.memory_space<vmem>>, vector<16x8xf32>
    tpu.vector_store %arg8[%c0_17, %c0_18], %22 {strides = array<i32>} : memref<16x8xf32, #tpu.memory_space<vmem>>, vector<16x8xf32>,
    return
  }
  func.func @transform_0(%arg0: i32) -> (i32, i32) {
    %c0_i32 = arith.constant 0 : i32
    %c0_i32_0 = arith.constant 0 : i32
    return %arg0, %c0_i32 : i32, i32
  }
  func.func @transform_1(%arg0: i32) -> (i32, i32) {
    %c0_i32 = arith.constant 0 : i32
    %c0_i32_0 = arith.constant 0 : i32
    %c0_i32_1 = arith.constant 0 : i32
    return %c0_i32, %c0_i32_0 : i32, i32
  }
  func.func @transform_2(%arg0: i32) -> (i32, i32) {
    %c0_i32 = arith.constant 0 : i32
    %c0_i32_0 = arith.constant 0 : i32
    %c0_i32_1 = arith.constant 0 : i32
    return %c0_i32, %c0_i32_0 : i32, i32
  }
  func.func @transform_3(%arg0: i32) -> (i32, i32) {
    %c0_i32 = arith.constant 0 : i32
    %c0_i32_0 = arith.constant 0 : i32
    %c0_i32_1 = arith.constant 0 : i32
    return %c0_i32, %c0_i32_0 : i32, i32
  }
  func.func @transform_4(%arg0: i32) -> (i32, i32) {
    %c0_i32 = arith.constant 0 : i32
    %c0_i32_0 = arith.constant 0 : i32
    %c0_i32_1 = arith.constant 0 : i32
    return %c0_i32, %c0_i32_0 : i32, i32
  }
  func.func @transform_5(%arg0: i32) -> (i32, i32) {
    %c0_i32 = arith.constant 0 : i32
    %c0_i32_0 = arith.constant 0 : i32
    %c0_i32_1 = arith.constant 0 : i32
    return %c0_i32, %c0_i32_0 : i32, i32
  }
  func.func @transform_6(%arg0: i32) -> (i32, i32) {
    %c0_i32 = arith.constant 0 : i32
    %c0_i32_0 = arith.constant 0 : i32
    %c0_i32_1 = arith.constant 0 : i32
    return %c0_i32, %c0_i32_0 : i32, i32
  }
  func.func @transform_7(%arg0: i32) -> (i32, i32) {
    %c0_i32 = arith.constant 0 : i32
    %c0_i32_0 = arith.constant 0 : i32
    return %arg0, %c0_i32 : i32, i32
  }
}

</mosaic_0001>

<bundles_post_ra>
// kernel: tpu_custom_call.1
= control target key start
LH: loop header
LB: loop body
LE: loop exit
PB: predicated region body
PF: predicated region fallthrough
CT: control target
= control target key end

     0   :  { %12 = vsyncpa [#allocation3], 0  ;;  %s546_s0 = inlined_call_operand.hbm [shape: f32[16,32], index: 0, kind: input, shape index: {}]   ;;  %s547_s1 = inlined_call_operand.hbm [shape: bf16[32,128], index: 1, kind: input, shape index: {}]   ;;  %s548_s2 = inlined_call_operand.vmem [shape: f32[1,128], index: 2, kind: input, shape index: {}]   ;;  %s549_s3 = inlined_call_operand.vmem [shape: bf16[128,128], index: 3, kind: input, shape index: {}]   ;;  %s550_s4 = inlined_call_operand.vmem [shape: f32[1,128], index: 4, kind: input, shape index: {}]   ;;  %s551_s5 = inlined_call_operand.vmem [shape: bf16[128,8], index: 5, kind: input, shape index: {}]   ;;  %s552_s6 = inlined_call_operand.vmem [shape: f32[1,8], index: 6, kind: input, shape index: {}]   ;;  %s553_s7 = inlined_call_operand.vmem [shape: f32[16,8], index: 7, kind: output, shape index: {}]  }
   0x1   :  { %s18_s26 = sshll.u32 %s546_s0, 4  ;;  %s19_s26 = int_to_ptr.hbm [resolvable:$true] %s18_s26 }
   0x2   :  { %13 = vsyncpa [#allocation5], 0  ;;  %s431_s27 = smov [#allocation2]   ;;  %s31_s8 = sshll.u32 %s547_s1, 4  ;;  %s32_s8 = int_to_ptr.hbm [resolvable:$true] %s31_s8 }
   0x3   :  { %s20_s28 = sshll.u32 %s431_s27, 4  ;;  %s432_s9 = smov 128   ;;  %s21_s28 = int_to_ptr.vmem [resolvable:$true] %s20_s28 }
   0x4   :  { %s433_s10 = smov 8   ;;  %s434_s11 = smov [#allocation4]  }
   0x5   :  { %26 = dma.hbm_to_vmem [thread:$0]  %s19_s26, 256, %s21_s28, [#allocation3], %s432_s9, %s432_s9, %s433_s10  }
   0x6   :  { %s33_s12 = sshll.u32 %s434_s11, 4  ;;  %s435_s13 = smov 64   ;;  %s34_s12 = int_to_ptr.vmem [resolvable:$true] %s33_s12 }
   0x7   :  { %s436_s14 = smov 4  }
   0x8   :  { %39 = dma.hbm_to_vmem [thread:$0]  %s32_s8, 256, %s34_s12, [#allocation5], %s435_s13, %s435_s13, %s436_s14  }
   0x9   :  { %427 = dma.done.wait [#allocation3], 256  }
   0xa   :  { %428 = vsyncadd [#allocation3], 4294967040 }
   0xb   :  { %429 = dma.done.wait [#allocation5], 256  }
   0xc   :  { %430 = vsyncadd [#allocation5], 4294967040  ;;  %v353_v0 = vld [vmem:[#allocation4 + $0x8] sm:$0xff]  ;;  %v352_v1 = vld [vmem:[#allocation4] sm:$0xff]  ;;  %vm82_vm0 = vcmask 261120   ;;  %vm270_vm1 = vcmask 64512  }
   0xd   :  { %v361_v2 = vld [vmem:[%s549_s3 + $0x38] sm:$0xff]  ;;  %92 = vmatpush.bf16.msra.mxu0 %v353_v0  ;;  %v59_v3 = vld [vmem:[#allocation2] sm:$0xff]  ;;  %v60_v4 = vld [vmem:[#allocation2 + $0x8] sm:$0xff] }
   0xe   :  { %171 = vmatpush.bf16.msra.mxu1 %v361_v2  ;;  %v360_v5 = vld [vmem:[%s549_s3 + $0x30] sm:$0xff]  ;;  %v61_v6 = vpack.c.bf16 %v60_v4, %v59_v3  ;;  %v359_v7 = vld [vmem:[%s549_s3 + $0x28] sm:$0xff]  ;;  %v358_v8 = vld [vmem:[%s549_s3 + $0x20] sm:$0xff] }
   0xf   :  { %v357_v9 = vld [vmem:[%s549_s3 + $0x18] sm:$0xff]  ;;  %v356_v10 = vld [vmem:[%s549_s3 + $0x10] sm:$0xff]  ;;  %v355_v11 = vld [vmem:[%s549_s3 + $0x8] sm:$0xff] }
  0x10   :  { %v354_v12 = vld [vmem:[%s549_s3] sm:$0xff]  ;;  %v369_v13 = vld [vmem:[%s551_s5 + $0x38] sm:$0xff]  ;;  %v368_v14 = vld [vmem:[%s551_s5 + $0x30] sm:$0xff] }
  0x11   :  { %93 = vmatpush.bf16.msra.mxu0 %v352_v1  ;;  %256 = vmatpush.bf16.msra.mxu2 %v369_v13  ;;  %v367_v15 = vld [vmem:[%s551_s5 + $0x28] sm:$0xff]  ;;  %v366_v16 = vld [vmem:[%s551_s5 + $0x20] sm:$0xff]  ;;  %v365_v25 = vld [vmem:[%s551_s5 + $0x18] sm:$0xff] }
  0x12   :  { %172 = vmatpush.bf16.msra.mxu1 %v360_v5  ;;  %v376_v18 = vld [vmem:[%s548_s2] ss:$0 sm:$0xff]  ;;  %v364_v26 = vld [vmem:[%s551_s5 + $0x10] sm:$0xff]  ;;  %v363_v27 = vld [vmem:[%s551_s5 + $0x8] sm:$0xff] }
  0x13   :  { %v362_v28 = vld [vmem:[%s551_s5] sm:$0xff] }
  0x14   :  { %287 = vmatmul.msk.bf16.vlgmr.msra.gmra.mxu0 %vm82_vm0, %v61_v6  ;;  %v377_v30 = vld [vmem:[%s550_s4] ss:$0 sm:$0xff] }
  0x15   :  { %257 = vmatpush.bf16.msra.mxu2 %v368_v14  ;;  %v378_v37 = vld [vmem:[%s552_s6] ss:$0 sm:$0xff] }
  0x16   :  { %173 = vmatpush.bf16.msra.mxu1 %v359_v7 }
  0x19   :  { %258 = vmatpush.bf16.msra.mxu2 %v367_v15 }
  0x1a   :  { %174 = vmatpush.bf16.msra.mxu1 %v358_v8 }
  0x1d   :  { %259 = vmatpush.bf16.msra.mxu2 %v366_v16 }
  0x1e   :  { %175 = vmatpush.bf16.msra.mxu1 %v357_v9 }
  0x21   :  { %260 = vmatpush.bf16.msra.mxu2 %v365_v25 }
  0x22   :  { %176 = vmatpush.bf16.msra.mxu1 %v356_v10 }
  0x25   :  { %261 = vmatpush.bf16.msra.mxu2 %v364_v26 }
  0x26   :  { %177 = vmatpush.bf16.msra.mxu1 %v355_v11 }
  0x29   :  { %262 = vmatpush.bf16.msra.mxu2 %v363_v27 }
  0x2a   :  { %178 = vmatpush.bf16.msra.mxu1 %v354_v12 }
  0x2d   :  { %263 = vmatpush.bf16.msra.mxu2 %v362_v28 }
  0x91   :  { %v95_v17 = vpop.f32.mrf.mxu0 }
  0x92   :  { %v96_v19 = vadd.f32 %v376_v18, %v95_v17 }
  0x94   :  { %v100_v22 = vmax.f32 %v96_v19, 0.0 }
  0x99   :  { %v97_v20 = vpop.f32.mrf.mxu0 }
  0x9a   :  { %v98_v21 = vadd.f32 %v376_v18, %v97_v20 }
  0x9c   :  { %v101_v23 = vmax.f32 %v98_v21, 0.0 }
  0x9e   :  { %v102_v24 = vpack.c.bf16 %v101_v23, %v100_v22 }
  0xa0   :  { %179 = vmatmul.bf16.vlgmr.msra.gmra.mxu1 %v102_v24 }
 0x11d   :  { %v180_v29 = vpop.f32.mrf.mxu1 }
 0x11e   :  { %v181_v31 = vadd.f32 %v377_v30, %v180_v29 }
 0x120   :  { %v185_v34 = vmax.f32 %v181_v31, 0.0 }
 0x125   :  { %v182_v32 = vpop.f32.mrf.mxu1 }
 0x126   :  { %v183_v33 = vadd.f32 %v377_v30, %v182_v32 }
 0x128   :  { %v186_v35 = vmax.f32 %v183_v33, 0.0 }
 0x12a   :  { %v187_v36 = vpack.c.bf16 %v186_v35, %v185_v34 }
 0x12c   :  { %264 = vmatmul.bf16.vlgmr.msra.gmra.mxu2 %v187_v36 }
 0x1af   :  { %v265_v38 = vpop.f32.mrf.mxu2 }
 0x1b0   :  { %v266_v39 = vadd.f32 %v378_v37, %v265_v38 }
 0x1b2   :  { %271 = vst.msk [vmem:[%s553_s7] sm:$0xff] %vm270_vm1, %v266_v39 }
 0x1b7   :  { %v267_v40 = vpop.f32.mrf.mxu2 }
 0x1b8   :  { %v268_v41 = vadd.f32 %v378_v37, %v267_v40 }
 0x1ba   :  { %272 = vst.msk [vmem:[%s553_s7 + $0x8] sm:$0xff] %vm270_vm1, %v268_v41 }
 0x1bb   :  { %277 = vsyncpa [#allocation3], 1 }
 0x1bc   :  { %278 = vsyncpa [#allocation5], 1 }

</bundles_post_ra>
